<compile_context>
chip_gen: v7x
topology: tpu7x:2x2x1
jax: 0.10.0
libtpu: 0.0.40
codegen_flags: <defaults>
</compile_context>

<pallas_src>
import jax
import jax.numpy as jnp
from jax import lax
from jax.experimental import pallas as pl
from jax.experimental.pallas import tpu as pltpu


def _make_ncc_kernel(eps_scale: float, scale: float, hw: int, tile_m: int,
                     need_mask: bool):
    s2 = float(scale) * float(scale)   # scale applied after the C-reduce
                                       # (eps kept absolute -> bit-faithful)

    def ncc_kernel(p_ref, l_ref, o_ref, acc_ref):
        m = pl.program_id(1)

        @pl.when(m == 0)
        def _init():
            acc_ref[...] = jnp.zeros_like(acc_ref)

        p = p_ref[...].astype(jnp.float32)          # (C, TM)
        l = l_ref[...].astype(jnp.float32)          # (C, TM)

        if need_mask:
            lane = lax.broadcasted_iota(jnp.int32, p.shape, 1)
            valid = (m * tile_m + lane) < hw
            p = jnp.where(valid, p, 0.0)
            l = jnp.where(valid, l, 0.0)            # masked lanes give ncc==0

        dot = jnp.sum(p * l, axis=0, keepdims=True) * s2   # (1, TM)
        pp = jnp.sum(p * p, axis=0, keepdims=True) * s2    # (1, TM)
        ll = jnp.sum(l * l, axis=0, keepdims=True) * s2    # (1, TM)

        # divide + sqrt kept (vs approx rsqrt) for bit-faithfulness; the
        # kernel is HBM-bound so the VPU/EUP cost is hidden anyway.
        acc_ref[...] += dot / jnp.sqrt(pp * ll + eps_scale)

        @pl.when(m == pl.num_programs(1) - 1)
        def _finalize():
            part = jnp.sum(acc_ref[...], axis=1, keepdims=True)   # (1, 1)
            o_ref[...] = jnp.broadcast_to(part, (1, 128))          # lane-dense

    return ncc_kernel


def ncc_loss(pred, inv_lab, eps_scale: float = 1e-4, scale: float = 1e5,
             tile_m: int = 32768):
    """pred, inv_lab: (N, C, H, W) arrays (any float dtype). Scalar f32 loss."""
    # TODO(synk): ddf_stn (external spatial-transform module) path is not
    # implemented; only the identity (ddf_stn=None) path is reproduced.
    N, C, H, W = pred.shape
    HW = H * W
    M = N * HW

    # Contiguity-preserving reshape only -- no HBM transpose, no dtype cast.
    p = pred.reshape(N, C, HW)
    l = inv_lab.reshape(N, C, HW)

    # Pick the lane-tile: as big as possible, multiple of 128 (or full HW).
    tm = min(int(tile_m), HW)
    if tm < HW:
        tm = max(128, (tm // 128) * 128)
    need_mask = (HW % tm) != 0
    num_m = pl.cdiv(HW, tm)

    kernel = _make_ncc_kernel(float(eps_scale), float(scale), HW, tm, need_mask)

    partial = pl.pallas_call(
        kernel,
        out_shape=jax.ShapeDtypeStruct((N, 1, 128), jnp.float32),
        grid_spec=pltpu.PrefetchScalarGridSpec(
            num_scalar_prefetch=0,
            grid=(N, num_m),
            in_specs=[
                pl.BlockSpec((pl.Squeezed(), C, tm), lambda n, m: (n, 0, m)),
                pl.BlockSpec((pl.Squeezed(), C, tm), lambda n, m: (n, 0, m)),
            ],
            out_specs=pl.BlockSpec((pl.Squeezed(), 1, 128),
                                   lambda n, m: (n, 0, 0)),
            scratch_shapes=[pltpu.VMEM((1, tm), jnp.float32)],
        ),
        compiler_params=pltpu.CompilerParams(
            dimension_semantics=("parallel", "arbitrary")),
    )(p, l)

    # Per-batch partial sums -> global mean (true element count M).
    return jnp.sum(partial[:, 0, 0]) / jnp.float32(M)


def ncc_loss_ref(pred, inv_lab, eps_scale: float = 1e-4, scale: float = 1e5):
    """Pure-JAX reference mirroring the PyTorch forward."""
    p = scale * pred.astype(jnp.float32)
    l = scale * inv_lab.astype(jnp.float32)
    num = jnp.sum(p * l, axis=1)
    den = jnp.sqrt(jnp.sum(p * p, axis=1) * jnp.sum(l * l, axis=1) + eps_scale)
    return jnp.mean(num / den)


if __name__ == "__main__":
    key = jax.random.PRNGKey(0)
    k1, k2 = jax.random.split(key)
    N, C, H, W = 2, 4, 16, 16
    pred = jax.random.normal(k1, (N, C, H, W), dtype=jnp.float32)
    inv_lab = jax.random.normal(k2, (N, C, H, W), dtype=jnp.float32)

    loss = jax.block_until_ready(ncc_loss(pred, inv_lab))
    ref = jax.block_until_ready(ncc_loss_ref(pred, inv_lab))

    assert jnp.isfinite(loss), "kernel produced non-finite loss"
    assert jnp.allclose(loss, ref, rtol=1e-4, atol=1e-5), (loss, ref)
    print("KERNEL_OK")
</pallas_src>

<mosaic_0001>
module attributes {stable_mosaic.version = 11 : i64} {
  func.func @ncc_kernel(%arg0: i32, %arg1: i32, %arg2: memref<1x4x256xf32, #tpu.memory_space<vmem>>, %arg3: memref<1x4x256xf32, #tpu.memory_space<vmem>>, %arg4: memref<1x1x128xf32, #tpu.memory_space<vmem>>, %arg5: memref<1x256xf32, #tpu.memory_space<vmem>>) attributes {dimension_semantics = [#tpu.dimension_semantics<parallel>, #tpu.dimension_semantics<arbitrary>], iteration_bounds = array<i64: 2, 1>, scalar_prefetch = 0 : i64, scratch_operands = 1 : i64, tpu.core_type = #tpu.core_type<tc>, window_params = [{transform_indices = @transform_0, window_bounds = array<i64: 1, 4, 256>}, {transform_indices = @transform_1, window_bounds = array<i64: 1, 4, 256>}, {transform_indices = @transform_2, window_bounds = array<i64: 1, 1, 128>}]} {
    %c0_i32 = arith.constant 0 : i32
    %0 = arith.cmpi eq, %arg1, %c0_i32 : i32
    %1 = arith.extui %0 : i1 to i32
    %c0_i32_0 = arith.constant 0 : i32
    %2 = arith.cmpi ne, %1, %c0_i32_0 : i32
    scf.if %2 {
      %cst_18 = arith.constant 0.000000e+00 : f32
      %33 = vector.broadcast %cst_18 : f32 to vector<1x256xf32>
      %c0_19 = arith.constant 0 : index
      %c0_20 = arith.constant 0 : index
      %34 = vector.load %arg5[%c0_19, %c0_20] : memref<1x256xf32, #tpu.memory_space<vmem>>, vector<1x256xf32>
      tpu.vector_store %arg5[%c0_19, %c0_20], %33 {strides = array<i32>} : memref<1x256xf32, #tpu.memory_space<vmem>>, vector<1x256xf32>,
    } else {
    }
    %c0 = arith.constant 0 : index
    %c0_1 = arith.constant 0 : index
    %c0_2 = arith.constant 0 : index
    %3 = vector.load %arg2[%c0, %c0_1, %c0_2] : memref<1x4x256xf32, #tpu.memory_space<vmem>>, vector<1x4x256xf32>
    %4 = vector.shape_cast %3 : vector<1x4x256xf32> to vector<4x256xf32>
    %c0_3 = arith.constant 0 : index
    %c0_4 = arith.constant 0 : index
    %c0_5 = arith.constant 0 : index
    %5 = vector.load %arg3[%c0_3, %c0_4, %c0_5] : memref<1x4x256xf32, #tpu.memory_space<vmem>>, vector<1x4x256xf32>
    %6 = vector.shape_cast %5 : vector<1x4x256xf32> to vector<4x256xf32>
    %7 = arith.mulf %4, %6 : vector<4x256xf32>
    %cst = arith.constant dense<0.000000e+00> : vector<256xf32>
    %8 = vector.multi_reduction <add>, %7, %cst [0] : vector<4x256xf32> to vector<256xf32>
    %9 = vector.shape_cast %8 : vector<256xf32> to vector<1x256xf32>
    %cst_6 = arith.constant 1.000000e+10 : f32
    %10 = vector.broadcast %cst_6 : f32 to vector<1x256xf32>
    %11 = arith.mulf %9, %10 : vector<1x256xf32>
    %12 = arith.mulf %4, %4 : vector<4x256xf32>
    %cst_7 = arith.constant dense<0.000000e+00> : vector<256xf32>
    %13 = vector.multi_reduction <add>, %12, %cst_7 [0] : vector<4x256xf32> to vector<256xf32>
    %14 = vector.shape_cast %13 : vector<256xf32> to vector<1x256xf32>
    %cst_8 = arith.constant 1.000000e+10 : f32
    %15 = vector.broadcast %cst_8 : f32 to vector<1x256xf32>
    %16 = arith.mulf %14, %15 : vector<1x256xf32>
    %17 = arith.mulf %6, %6 : vector<4x256xf32>
    %cst_9 = arith.constant dense<0.000000e+00> : vector<256xf32>
    %18 = vector.multi_reduction <add>, %17, %cst_9 [0] : vector<4x256xf32> to vector<256xf32>
    %19 = vector.shape_cast %18 : vector<256xf32> to vector<1x256xf32>
    %cst_10 = arith.constant 1.000000e+10 : f32
    %20 = vector.broadcast %cst_10 : f32 to vector<1x256xf32>
    %21 = arith.mulf %19, %20 : vector<1x256xf32>
    %c0_11 = arith.constant 0 : index
    %c0_12 = arith.constant 0 : index
    %22 = vector.load %arg5[%c0_11, %c0_12] : memref<1x256xf32, #tpu.memory_space<vmem>>, vector<1x256xf32>
    %23 = arith.mulf %16, %21 : vector<1x256xf32>
    %cst_13 = arith.constant 9.99999974E-5 : f32
    %24 = vector.broadcast %cst_13 : f32 to vector<1x256xf32>
    %25 = arith.addf %23, %24 : vector<1x256xf32>
    %26 = math.sqrt %25 : vector<1x256xf32>
    %27 = arith.divf %11, %26 : vector<1x256xf32>
    %28 = arith.addf %22, %27 : vector<1x256xf32>
    %c0_14 = arith.constant 0 : index
    %c0_15 = arith.constant 0 : index
    %29 = vector.load %arg5[%c0_14, %c0_15] : memref<1x256xf32, #tpu.memory_space<vmem>>, vector<1x256xf32>
    tpu.vector_store %arg5[%c0_14, %c0_15], %28 {strides = array<i32>} : memref<1x256xf32, #tpu.memory_space<vmem>>, vector<1x256xf32>,
    %c0_i32_16 = arith.constant 0 : i32
    %30 = arith.cmpi eq, %arg1, %c0_i32_16 : i32
    %31 = arith.extui %30 : i1 to i32
    %c0_i32_17 = arith.constant 0 : i32
    %32 = arith.cmpi ne, %31, %c0_i32_17 : i32
    scf.if %32 {
      %c0_18 = arith.constant 0 : index
      %c0_19 = arith.constant 0 : index
      %33 = vector.load %arg5[%c0_18, %c0_19] : memref<1x256xf32, #tpu.memory_space<vmem>>, vector<1x256xf32>
      %cst_20 = arith.constant dense<0.000000e+00> : vector<1xf32>
      %34 = vector.multi_reduction <add>, %33, %cst_20 [1] : vector<1x256xf32> to vector<1xf32>
      %35 = vector.shape_cast %34 : vector<1xf32> to vector<1x1xf32>
      %36 = vector.shape_cast %35 : vector<1x1xf32> to vector<1x1xf32>
      %37 = vector.broadcast %36 : vector<1x1xf32> to vector<1x128xf32>
      %c0_21 = arith.constant 0 : index
      %c0_22 = arith.constant 0 : index
      %c0_23 = arith.constant 0 : index
      %38 = vector.load %arg4[%c0_21, %c0_22, %c0_23] : memref<1x1x128xf32, #tpu.memory_space<vmem>>, vector<1x1x128xf32>
      %39 = vector.shape_cast %38 : vector<1x1x128xf32> to vector<1x128xf32>
      %40 = vector.shape_cast %37 : vector<1x128xf32> to vector<1x1x128xf32>
      tpu.vector_store %arg4[%c0_21, %c0_22, %c0_23], %40 {strides = array<i32>} : memref<1x1x128xf32, #tpu.memory_space<vmem>>, vector<1x1x128xf32>,
    } else {
    }
    return
  }
  func.func @transform_0(%arg0: i32, %arg1: i32) -> (i32, i32, i32) {
    %c0_i32 = arith.constant 0 : i32
    %c0_i32_0 = arith.constant 0 : i32
    return %arg0, %c0_i32, %arg1 : i32, i32, i32
  }
  func.func @transform_1(%arg0: i32, %arg1: i32) -> (i32, i32, i32) {
    %c0_i32 = arith.constant 0 : i32
    %c0_i32_0 = arith.constant 0 : i32
    return %arg0, %c0_i32, %arg1 : i32, i32, i32
  }
  func.func @transform_2(%arg0: i32, %arg1: i32) -> (i32, i32, i32) {
    %c0_i32 = arith.constant 0 : i32
    %c0_i32_0 = arith.constant 0 : i32
    %c0_i32_1 = arith.constant 0 : i32
    return %arg0, %c0_i32, %c0_i32_0 : i32, i32, i32
  }
}

</mosaic_0001>

<bundles_post_ra>
// kernel: tpu_custom_call.1
= control target key start
LH: loop header
LB: loop body
LE: loop exit
PB: predicated region body
PF: predicated region fallthrough
CT: control target
= control target key end

     0   :  { %7 = vsyncpa [#allocation4], 0  ;;  %s976_s0 = inlined_call_operand.hbm [shape: f32[2,4,256], index: 0, kind: input, shape index: {}]   ;;  %s977_s1 = inlined_call_operand.hbm [shape: f32[2,4,256], index: 1, kind: input, shape index: {}]   ;;  %s978_s2 = inlined_call_operand.hbm [shape: f32[2,1,128], index: 2, kind: output, shape index: {}]  }
   0x1   :  { %9 = vsyncpa [#allocation4 + $0x1], 0 }
   0x2   :  { %10 = vsyncpa [#allocation7], 0 }
   0x3   :  { %12 = vsyncpa [#allocation7 + $0x1], 0 }
   0x4   :  { %13 = vsyncpa [#allocation5], 0 }
   0x5   :  { %15 = vsyncpa [#allocation5 + $0x1], 0  ;;  %s739_s9 = smov 0   ;;  %s741_s10 = smov 0  }
   0x6   :  { %s743_s11 = smov 0   ;;  %s745_s12 = smov 0  }
   0x7   :  { %s747_s13 = smov 0   ;;  %s749_s14 = smov 0  }
   0x8 LB: > { %s476_s15 = sadd.s32 4294967295, %s717_s14   ;;  %s477_s16 = sadd.s32 4294967294, %s717_s14   ;;  %s717_s14 = sphi %s749_s14, %s21_s14   ;;  %s713_s13 = sphi %s747_s13, %s1000_s13   ;;  %s709_s12 = sphi %s745_s12, %s999_s12   ;;  %s705_s11 = sphi %s743_s11, %s998_s11   ;;  %s701_s10 = sphi %s741_s10, %s997_s10   ;;  %s697_s9 = sphi %s739_s9, %s996_s9  }
   0x9   : > { %s33_s17 = sadd.s32 1, %s713_s13  ;;  %s42_s18 = sadd.s32 1, %s705_s11 }
   0xa   : > { %p35_p0 = scmp.ge.s32.totalorder %s33_s17, 2  ;;  %p49_p1 = scmp.ne.s32.totalorder %s705_s11, %s701_s10 }
   0xb   : > { %p50_p2 = scmp.eq.s32.totalorder %s717_s14, 0  ;;  %p55_p3 = scmp.ne.s32.totalorder %s701_s10, %s697_s9 }
   0xc   : > { %s1002_s17 = smov (%p35_p0, %s33_s17), 0  ;;  %p56_p5 = scmp.eq.s32.totalorder %s476_s15, 0 }
   0xd   : > { %p780_p4 = por %p50_p2, %p49_p1  ;;  %s37_s20 = ssub.s32 %s713_s13, %s1002_s17 }
   0xe   : > { %p107_p6 = scmp.eq.s32.totalorder %s476_s15, 1  ;;  %p40_p7 = scmp.eq.s32.totalorder %s37_s20, 0 }
   0xf   : > { %p786_p8 = por %p56_p5, %p55_p3  ;;  %p113_p10 = scmp.eq.s32.totalorder %s477_s16, 1 }
  0x10   : > { %p790_p9 = por %p107_p6, %p49_p1  ;;  %p511_p13 = scmp.lt.s32.totalorder %s717_s14, 2 }
  0x11   : > { %s982_s21 = scalar_select %p786_p8, 1, 0 }
  0x12   : > { %s983_s22 = scalar_select %p790_p9, 1, 0 }
  0x13   : > { %s795_s23 = scalar_select %p40_p7, %s705_s11, %s42_s18  }
  0x14   : > { %p797_p11 = por %p113_p10, %p55_p3  ;;  %s804_s25 = sand.u32 1, %s705_s11  }
  0x15   : > { %s480_s26 = sshll.u32 %s804_s25, 3  ;;  %s492_s27 = sshll.u32 %s713_s13, 7 }
  0x16   : > { %s984_s24 = scalar_select %p797_p11, 1, 0 }
  0x17   : > { %s813_s30 = scalar_lea.hbm %s976_s0, %s492_s27  ;;  %s137_s3 = scalar_lea.vmem [#allocation3], %s480_s26 }
  0x18   : > { %s147_s4 = sshll.u32 %s137_s3, 4  ;;  %p821_p0 = pnand %p511_p13, %p780_p4  ;;  %s817_s4 = int_to_ptr.vmem [resolvable:$true] %s147_s4 }
  0x19   : > { %s134_s6 = scalar_lea.sflag [#allocation4], %s804_s25  ;;  %s571_s7 = scalar_lea.hbm %s813_s30, 128 }
  0x1a   : > { %p572_p3 = scmp.ne.s32.totalorder %s813_s30, %s571_s7  ;;  %p573_p5 = pneg %p821_p0 }
  0x1b   : > { %s576_s16 = scalar_lea.hbm %s976_s0, 256  ;;  %p577_p4 = scmp.lt.u32.totalorder %s813_s30, %s976_s0 }
  0x1c   : > { %p574_p6 = pnand %p573_p5, %p572_p3  ;;  %p578_p10 = scmp.lt.u32.totalorder %s576_s16, %s571_s7 }
  0x1d   : > { %p580_p12 = scmp.lt.u32.totalorder %s571_s7, %s813_s30 }
  0x1e   : > { %p575_p7 = pneg %p574_p6  ;;  %p579_p13 = por %p578_p10, %p577_p4 }
  0x20   : > { %p581_p1 = por %p580_p12, %p579_p13 }
  0x22   : > { %p582_p2 = pnand %p581_p1, %p575_p7 }
  0x24   : > { %585 = shalt.err (!%p582_p2)
}
  0x25   : > { %s586_s20 = scalar_lea.vmem %s817_s4, 128  ;;  %s719_s28 = smov [#allocation3]  }
  0x26   : > { %p587_p3 = scmp.ne.s32.totalorder %s817_s4, %s586_s20  ;;  %s591_s29 = sshll.u32 %s719_s28, 4  ;;  %s592_s29 = int_to_ptr.vmem [resolvable:$false] %s591_s29 }
  0x27   : > { %s593_s3 = scalar_lea.vmem %s592_s29, 256  ;;  %p594_p9 = scmp.lt.s32.totalorder %s817_s4, %s592_s29 }
  0x28   : > { %p589_p6 = pnand %p587_p3, %p573_p5  ;;  %p595_p4 = scmp.lt.s32.totalorder %s593_s3, %s586_s20 }
  0x2a   : > { %p590_p11 = pneg %p589_p6  ;;  %p596_p10 = por %p595_p4, %p594_p9 }
  0x2c   : > { %p597_p12 = pnand %p596_p10, %p590_p11 }
  0x2e   : > { %600 = shalt.err (!%p597_p12)
}
  0x2f   : > { %503 = dma.hbm_to_vmem [thread:$0]  (!%p821_p0), %s813_s30, 128, %s817_s4, %s134_s6  }
  0x30   : > { %p986_p1 = scmp.lt.s32.totalorder %s717_s14, 3  ;;  %p987_p2 = scmp.ge.s32.totalorder %s717_s14, 1 }
  0x31   : > { %s866_s16 = scalar_lea.hbm %s977_s1, %s492_s27  ;;  %s158_s18 = scalar_lea.vmem [#allocation6], %s480_s26 }
  0x32   : > { %p857_p7 = pnand %p987_p2, %p986_p1  ;;  %s168_s19 = sshll.u32 %s158_s18, 4  ;;  %s169_s19 = int_to_ptr.vmem [resolvable:$true] %s168_s19 }
  0x33   : > { %s155_s30 = scalar_lea.sflag [#allocation7], %s804_s25  ;;  %s601_s4 = scalar_lea.hbm %s866_s16, 128 }
  0x34   : > { %s988_s7 = scalar_select %p857_p7, 1, 0 }
  0x35   : > { %p602_p9 = scmp.ne.s32.totalorder %s866_s16, %s601_s4  ;;  %s606_s27 = scalar_lea.hbm %s977_s1, 256 }
  0x36   : > { %p607_p3 = scmp.lt.u32.totalorder %s866_s16, %s977_s1  ;;  %p608_p6 = scmp.lt.u32.totalorder %s606_s27, %s601_s4 }
  0x37   : > { %p604_p11 = pnand %p602_p9, %p573_p5  ;;  %p610_p10 = scmp.lt.u32.totalorder %s601_s4, %s866_s16 }
  0x38   : > { %p609_p4 = por %p608_p6, %p607_p3 }
  0x39   : > { %p605_p13 = pneg %p604_p11 }
  0x3a   : > { %p611_p12 = por %p610_p10, %p609_p4 }
  0x3c   : > { %p612_p1 = pnand %p611_p12, %p605_p13 }
  0x3e   : > { %615 = shalt.err (!%p612_p1)
}
  0x3f   : > { %s616_s25 = scalar_lea.vmem %s169_s19, 128  ;;  %s720_s26 = smov [#allocation6]  }
  0x40   : > { %p617_p2 = scmp.ne.s32.totalorder %s169_s19, %s616_s25  ;;  %s621_s3 = sshll.u32 %s720_s26, 4  ;;  %s622_s3 = int_to_ptr.vmem [resolvable:$false] %s621_s3 }
  0x41   : > { %s623_s8 = scalar_lea.vmem %s622_s3, 256  ;;  %p624_p8 = scmp.lt.s32.totalorder %s169_s19, %s622_s3 }
  0x42   : > { %p619_p9 = pnand %p617_p2, %p573_p5  ;;  %p625_p7 = scmp.lt.s32.totalorder %s623_s8, %s616_s25 }
  0x44   : > { %p620_p11 = pneg %p619_p9  ;;  %p626_p3 = por %p625_p7, %p624_p8 }
  0x46   : > { %p627_p6 = pnand %p626_p3, %p620_p11 }
  0x48   : > { %630 = shalt.err (!%p627_p6)
}
  0x49   : > { %506 = dma.hbm_to_vmem [thread:$0]  (!%p821_p0), %s866_s16, 128, %s169_s19, %s155_s30  }
  0x4a   : > { %p989_p13 = scmp.ne.s32.totalorder %s988_s7, 0 }
  0x4b   : > { %s893_s15 = sand.u32 (!%p989_p13), 1, %s701_s10   ;;  %p990_p5 = scmp.ne.s32.totalorder (!%p989_p13), %s982_s21, 0 }
  0x4c   : > { %177 = sbr.rel (%p989_p13) target bundleno = 315 (0x13b), region = 28  ;;  %s487_s18 = sshll.u32 (!%p989_p13), %s893_s15, 3 }
  0x4d   : > { %s180_s4 = scalar_lea.sflag (!%p989_p13), [#allocation4], %s893_s15  ;;  %s183_s6 = scalar_lea.vmem (!%p989_p13), [#allocation3], %s487_s18 }
  0x53   : > { %684 = dma.done.wait (%p990_p5), %s180_s4, 128  }
  0x54   : > { %686 = vsyncadd (%p990_p5), %s180_s4, 4294967168  ;;  %s189_s5 = scalar_lea.sflag [#allocation7], %s893_s15  ;;  %s192_s16 = scalar_lea.vmem [#allocation6], %s487_s18 }
  0x55   : > { %688 = dma.done.wait (%p990_p5), %s189_s5, 128  }
  0x56   : > { %690 = vsyncadd (%p990_p5), %s189_s5, 4294967168  ;;  %v223_v0 = vlaneseq  ;;  %v721_v2 = vmov 0.0   ;;  %v228_v3 = vld [vmem:[%s183_s6] sm:$0xff]  ;;  %v229_v4 = vld [vmem:[%s192_s16] sm:$0xff]  ;;  %vm234_vm1 = vcmask 1043456   ;;  %vm353_vm6 = vcmask 1040384  }
  0x57   : > { %v251_v5 = vmul.f32 %v228_v3, %v228_v3  ;;  %v271_v6 = vmul.f32 %v229_v4, %v229_v4  ;;  %v230_v30 = vmul.f32 %v229_v4, %v228_v3  ;;  %s216_s21 = scalar_lea.vmem [#allocation8], %s893_s15  ;;  %s489_s19 = sshll.u32 %s709_s12, 4 }
  0x58   : > { %vm907_vm0 = vcmp.lt.s32.totalorder %v223_v0, 256  ;;  %s373_s7 = sshll.u32 %s216_s21, 4  ;;  %s929_s27 = scalar_lea.hbm %s978_s2, %s489_s19  ;;  %s924_s7 = int_to_ptr.vmem [resolvable:$true] %s373_s7 }
  0x59   : > { %227 = vst.msk [vmem:[#allocation2] sm:$0x3] %vm907_vm0, %v721_v2  ;;  %v253_v7 = vcombine.high %v251_v5, %v251_v5  ;;  %v255_v8 = vsel %vm234_vm1, %v251_v5, 0.0  ;;  %v273_v10 = vcombine.high %v271_v6, %v271_v6  ;;  %v275_v11 = vsel %vm234_vm1, %v271_v6, 0.0  ;;  %s361_s28 = scalar_lea.sflag [#allocation5], %s893_s15  ;;  %s631_s29 = scalar_lea.vmem %s924_s7, 16 }
  0x5a   : > { %v256_v9 = vrot.slane %v255_v8, 4  ;;  %v276_v13 = vrot.slane %v275_v11, 4  ;;  %v232_v39 = vcombine.high %v230_v30, %v230_v30  ;;  %v235_v43 = vsel %vm234_vm1, %v230_v30, 0.0  ;;  %p632_p8 = scmp.ne.s32.totalorder %s924_s7, %s631_s29  ;;  %p993_p0 = scmp.ne.s32.totalorder %s983_s22, 0 }
  0x5b   : > { %v262_v12 = vsel %vm234_vm1, %v253_v7, 0.0  ;;  %v282_v17 = vsel %vm234_vm1, %v273_v10, 0.0  ;;  %v236_v47 = vrot.slane %v235_v43, 4  ;;  %s723_s25 = smov [#allocation8]  }
  0x5c   : > { %v257_v14 = vadd.f32 %v256_v9, %v255_v8  ;;  %v263_v15 = vrot.slane %v262_v12, 4  ;;  %v277_v16 = vadd.f32 %v276_v13, %v275_v11  ;;  %v283_v21 = vrot.slane %v282_v17, 4  ;;  %p633_p7 = pnand %p632_p8, %p993_p0  ;;  %s635_s12 = sshll.u32 %s723_s25, 4  ;;  %s636_s12 = int_to_ptr.vmem [resolvable:$false] %s635_s12 }
  0x5d   : > { %v242_v46 = vsel %vm234_vm1, %v232_v39, 0.0  ;;  %v237_v51 = vadd.f32 %v236_v47, %v235_v43  ;;  %v722_v9 = vmov 1966171168   ;;  %s637_s26 = scalar_lea.vmem %s636_s12, 32  ;;  %p638_p10 = scmp.lt.s32.totalorder %s924_s7, %s636_s12 }
  0x5e   : > { %v258_v18 = vrot.slane %v257_v14, 2  ;;  %v264_v19 = vadd.f32 %v263_v15, %v262_v12  ;;  %v278_v20 = vrot.slane %v277_v16, 2  ;;  %v284_v25 = vadd.f32 %v283_v21, %v282_v17  ;;  %p634_p4 = pneg %p633_p7  ;;  %p639_p12 = scmp.lt.s32.totalorder %s637_s26, %s631_s29 }
  0x5f   : > { %v243_v49 = vrot.slane %v242_v46, 4  ;;  %v238_v53 = vrot.slane %v237_v51, 2  ;;  %v318_v10 = vunpack.c.l.s4 %v722_v9  ;;  %v321_v15 = vshrl.u32 %v223_v0, 7 }
  0x60   : > { %v259_v22 = vadd.f32 %v258_v18, %v257_v14  ;;  %v265_v23 = vrot.slane %v264_v19, 2  ;;  %v279_v24 = vadd.f32 %v278_v20, %v277_v16  ;;  %v285_v29 = vrot.slane %v284_v25, 2  ;;  %p640_p1 = por %p639_p12, %p638_p10 }
  0x61   : > { %v244_v52 = vadd.f32 %v243_v49, %v242_v46  ;;  %v239_v58 = vadd.f32 %v238_v53, %v237_v51  ;;  %v319_v14 = vunpack.c.0.s8 %v318_v10 }
  0x62   : > { %v260_v26 = vrot.slane %v259_v22, 1  ;;  %v266_v27 = vadd.f32 %v265_v23, %v264_v19  ;;  %v280_v28 = vrot.slane %v279_v24, 1  ;;  %v286_v34 = vadd.f32 %v285_v29, %v284_v25  ;;  %p641_p2 = pnand %p640_p1, %p634_p4 }
  0x63   : > { %v245_v55 = vrot.slane %v244_v52, 2  ;;  %v240_v3 = vrot.slane %v239_v58, 1  ;;  %v322_v19 = vsub.s32 %v319_v14, %v321_v15  ;;  %v345_v25 = vsub.s32 0, %v321_v15 }
  0x64   : > { %v261_v31 = vadd.f32 %v260_v26, %v259_v22  ;;  %v267_v32 = vrot.slane %v266_v27, 1  ;;  %v281_v33 = vadd.f32 %v280_v28, %v279_v24  ;;  %v287_v37 = vrot.slane %v286_v34, 1  ;;  %v291_v22 = vld [vmem:[#allocation2] sm:$0x3] }
  0x65   : > { %v246_v61 = vadd.f32 %v245_v55, %v244_v52  ;;  %v241_v7 = vadd.f32 %v240_v3, %v239_v58  ;;  %v349_v26 = vsub.s32 1, %v321_v15 }
  0x66   : > { %v268_v35 = vadd.f32 %v267_v32, %v266_v27  ;;  %v269_v36 = vmul.f32 1e+10, %v261_v31  ;;  %v289_v38 = vmul.f32 1e+10, %v281_v33  ;;  %v288_v41 = vadd.f32 %v287_v37, %v286_v34 }
  0x67   : > { %v247_v5 = vrot.slane %v246_v61, 1  ;;  %v249_v11 = vmul.f32 1e+10, %v241_v7 }
  0x68   : > { %v270_v40 = vmul.f32 1e+10, %v268_v35  ;;  %v292_v42 = vmul.f32 %v289_v38, %v269_v36  ;;  %v290_v44 = vmul.f32 1e+10, %v288_v41 }
  0x69   : > { %v248_v8 = vadd.f32 %v247_v5, %v246_v61 }
  0x6a   : > { %v294_v45 = vadd.f32 0.0001, %v292_v42  ;;  %v293_v48 = vmul.f32 %v290_v44, %v270_v40 }
  0x6b   : > { %v250_v13 = vmul.f32 1e+10, %v248_v8 }
  0x6c   : > { %563 = vrsqrt.f32 %v294_v45  ;;  %v295_v50 = vadd.f32 0.0001, %v293_v48  ;;  %vm298_vm2 = vcmp.eq.f32.partialorder %v294_v45, inf  ;;  %v301_v56 = vand.u32 2147483648, %v294_v45 }
  0x6d   : > { %vm300_vm3 = vcmp.eq.f32.partialorder %v294_v45, 0.0 }
  0x6e   : > { %565 = vrsqrt.f32 %v295_v50  ;;  %vm305_vm4 = vcmp.eq.f32.partialorder %v295_v50, inf  ;;  %v308_v63 = vand.u32 2147483648, %v295_v50  ;;  %vm307_vm5 = vcmp.eq.f32.partialorder %v295_v50, 0.0 }
  0x76   : > { %v564_v54 = vpop.eup %563 }
  0x77   : > { %v297_v57 = vmul.f32 %v564_v54, %v294_v45 }
  0x78   : > { %v566_v60 = vpop.eup %565 }
  0x79   : > { %v299_v59 = vsel %vm298_vm2, %v294_v45, %v297_v57  ;;  %v304_v2 = vmul.f32 %v566_v60, %v295_v50 }
  0x7a   : > { %v302_v62 = vsel %vm300_vm3, %v301_v56, %v299_v59 }
  0x7b   : > { %567 = vrcp.f32 %v302_v62  ;;  %v306_v4 = vsel %vm305_vm4, %v295_v50, %v304_v2 }
  0x7c   : > { %v309_v6 = vsel %vm307_vm5, %v308_v63, %v306_v4 }
  0x7d   : > { %569 = vrcp.f32 %v309_v6 }
  0x85   : > { %v568_v12 = vpop.eup %567 }
  0x86   : > { %v311_v16 = vmul.f32 %v568_v12, %v249_v11 }
  0x87   : > { %v570_v17 = vpop.eup %569 }
  0x88   : > { %v313_v18 = vmul.f32 %v570_v17, %v250_v13 }
  0x8a   : > { %v316_v20 = vcombine.low %v311_v16, %v313_v18 }
  0x8c   : > { %v323_v21 = vrot.slane %v316_v20, %v322_v19 }
  0x8e   : > { %v330_v23 = vrot.slane %v323_v21, %v322_v19 }
  0x90   : > { %v332_v24 = vadd.f32 %v330_v23, %v291_v22 }
  0x92   : > { %337 = vst.msk [vmem:[#allocation2] sm:$0x3] %vm907_vm0, %v332_v24 }
  0x99   : > { %v341_v27 = vld [vmem:[#allocation2] sm:$0x3] }
  0x9a   : > { %v346_v0 = vrot.slane %v341_v27, %v345_v25  ;;  %v350_v28 = vrot.slane %v341_v27, %v349_v26 }
  0x9c   : > { %v354_v29 = vsel %vm353_vm6, %v346_v0, 0.0  ;;  %v355_v30 = vsel %vm353_vm6, %v350_v28, 0.0 }
  0x9d   : > { %v356_v31 = vadd.f32 %v355_v30, %v354_v29 }
  0x9f   : > { %357 = vadd.xlane.f32.xlu0 %v356_v31 }
 0x12c   : > { %v358_v1 = vpop.xlane.xlu0 %357 }
 0x12d   : > { %359 = vst [vmem:[%s216_s21] sm:$0x1] %v358_v1 }
 0x12e   : > { %644 = shalt.err (!%p641_p2)
}
 0x12f   : > { %s645_s3 = scalar_lea.hbm %s929_s27, 16  ;;  %s649_s18 = scalar_lea.hbm %s978_s2, 32 }
 0x130   : > { %p646_p9 = scmp.ne.s32.totalorder %s929_s27, %s645_s3  ;;  %p650_p6 = scmp.lt.u32.totalorder %s929_s27, %s978_s2 }
 0x131   : > { %p651_p13 = scmp.lt.u32.totalorder %s649_s18, %s645_s3  ;;  %p653_p8 = scmp.lt.u32.totalorder %s645_s3, %s929_s27 }
 0x132   : > { %p647_p11 = pnand %p646_p9, %p993_p0 }
 0x133   : > { %p652_p5 = por %p651_p13, %p650_p6 }
 0x134   : > { %p648_p3 = pneg %p647_p11 }
 0x135   : > { %p654_p7 = por %p653_p8, %p652_p5 }
 0x137   : > { %p655_p4 = pnand %p654_p7, %p648_p3 }
 0x139   : > { %658 = shalt.err (!%p655_p4)
}
 0x13a   : > { %498 = dma.vmem_to_hbm [thread:$0]  (%p993_p0), %s924_s7, 16, %s929_s27, %s361_s28  }
 0x13b PF: > { %s385_s5 = sand.u32 1, %s697_s9   ;;  %p994_p10 = scmp.ne.s32.totalorder %s984_s24, 0 }
 0x13c   : > { %p995_p12 = scmp.ge.s32.totalorder %s717_s14, 2  ;;  %s386_s16 = scalar_lea.sflag [#allocation5], %s385_s5 }
 0x13e   : > { %p508_p1 = pnand %p995_p12, %p994_p10 }
 0x140   : > { %692 = dma.done.wait (!%p508_p1), %s386_s16, 16  }
 0x141   : > { %694 = vsyncadd (!%p508_p1), %s386_s16, 4294967280  ;;  %s21_s14 = sadd.s32 1, %s717_s14   ;;  %s996_s9 = smov %s701_s10 }
 0x142   : > { %p18_p2 = scmp.ge.s32.totalorder %s21_s14, 4   ;;  %s997_s10 = smov %s705_s11 }
 0x143   : > { %s998_s11 = smov %s795_s23  ;;  %s999_s12 = smov %s713_s13 }
 0x144   : > { %s1000_s13 = smov %s1002_s17  ;;  %20 = sbr.rel (!%p18_p2) target bundleno = 8 (0x8), region = 94 }
 0x14b   :  { %390 = vsyncpa [#allocation4], 1 }
 0x14c   :  { %392 = vsyncpa [#allocation4 + $0x1], 1 }
 0x14d   :  { %393 = vsyncpa [#allocation7], 1 }
 0x14e   :  { %395 = vsyncpa [#allocation7 + $0x1], 1 }
 0x14f   :  { %396 = vsyncpa [#allocation5], 1 }
 0x150   :  { %398 = vsyncpa [#allocation5 + $0x1], 1 }

</bundles_post_ra>
